<compile_context>
chip_gen: v5e
topology: v5e:2x2
jax: 0.10.0
libtpu: 0.0.40
codegen_flags: <defaults>
</compile_context>

<pallas_src>
import functools
import math

import jax
import jax.numpy as jnp
import numpy as np
from jax import lax
from jax.experimental import pallas as pl
from jax.experimental.pallas import tpu as pltpu

# Safe scoped-VMEM budget on every generation (v5e default 16 MiB, v7x physical 64 MiB).
_VMEM_LIMIT_BYTES = 32 * 1024 * 1024


def _pick_tile(dim, target, align):
    """Largest tile <= target dividing `dim`; a multiple of `align` when tiling."""
    if dim <= target:
        return dim
    t = (target // align) * align
    while t >= align:
        if dim % t == 0:
            return t
        t -= align
    for t in range(min(target, dim), 0, -1):  # fallback (not hit for aligned dims)
        if dim % t == 0:
            return t
    return dim


def _fast_recip(x):
    """EUP vrcp seed (free bundle slot) + one Newton step -> ~f32 accuracy."""
    inv = pl.reciprocal(x, approx=True)
    return inv * (2.0 - x * inv)


# ---------------------------------------------------------------------------
# Kernel 1: fused LayerNorm + dense projection
#   y[i, j] = LN(x[i, :]) @ W[:, j] + bias[j]
#   LayerNorm exactly as the PyTorch module: a*(x-mean)/(std+eps)+b with the
#   UNBIASED (N-1) std estimator (torch.Tensor.std default).
# ---------------------------------------------------------------------------
def _ln_linear_kernel(x_ref, a_ref, b_ref, w_ref, bias_ref, o_ref, *, eps):
    x = x_ref[...].astype(jnp.float32)
    d = x.shape[-1]
    mean = jnp.mean(x, axis=-1, keepdims=True)
    xc = x - mean
    var = jnp.sum(xc * xc, axis=-1, keepdims=True) * (1.0 / (d - 1))
    denom = jnp.sqrt(var) + eps
    hn = a_ref[...].astype(jnp.float32) * (xc * _fast_recip(denom)) \
        + b_ref[...].astype(jnp.float32)
    acc = jnp.dot(hn.astype(w_ref.dtype), w_ref[...],
                  preferred_element_type=jnp.float32)
    o_ref[...] = (acc + bias_ref[...].astype(jnp.float32)).astype(o_ref.dtype)


def ln_linear(x, ln_a, ln_b, w, bias, *, eps=1e-6, tm=256, tn=512, out_dtype=None):
    """x: [M, D], w: [D, N], bias: [N] -> LN(x) @ w + bias : [M, N]."""
    m, d = x.shape
    d2, n = w.shape
    assert d == d2 and bias.shape == (n,)
    out_dtype = out_dtype or x.dtype

    tm = _pick_tile(m, tm, 8)
    tn = _pick_tile(n, tn, 128)
    kernel = functools.partial(_ln_linear_kernel, eps=eps)

    return pl.pallas_call(
        kernel,
        out_shape=jax.ShapeDtypeStruct((m, n), out_dtype),
        grid=(m // tm, n // tn),
        in_specs=[
            pl.BlockSpec((tm, d), lambda i, j: (i, 0)),   # full row needed for LN stats
            pl.BlockSpec((1, d), lambda i, j: (0, 0)),
            pl.BlockSpec((1, d), lambda i, j: (0, 0)),
            pl.BlockSpec((d, tn), lambda i, j: (0, j)),
            pl.BlockSpec((1, tn), lambda i, j: (0, j)),
        ],
        out_specs=pl.BlockSpec((tm, tn), lambda i, j: (i, j)),
        compiler_params=pltpu.CompilerParams(
            dimension_semantics=("parallel", "parallel"),
            vmem_limit_bytes=_VMEM_LIMIT_BYTES,
        ),
    )(x, ln_a.reshape(1, d), ln_b.reshape(1, d), w, bias.reshape(1, n))


# ---------------------------------------------------------------------------
# Kernel 2: multi-headed attention + output projection + bias + residual,
#           one batch element per grid step (all heads processed per step).
#   qkv block : [S, 3*D] (q | k | v, each D = H*d_k wide, PyTorch concat order)
#   output    : [S, D]   (= concat_heads(softmax(QK^T/sqrt(dk)) V) @ Wo + bo + res)
# ---------------------------------------------------------------------------
def _attn_out_kernel(qkv_ref, wo_ref, bo_ref, res_ref, o_ref, *, n_heads, d_k, d_model):
    scale = 1.0 / math.sqrt(d_k)
    s = qkv_ref.shape[0]
    acc = jnp.zeros((s, d_model), jnp.float32)

    for h in range(n_heads):
        q = qkv_ref[:, h * d_k:(h + 1) * d_k] * scale            # scale q, not S^2 scores
        k = qkv_ref[:, d_model + h * d_k: d_model + (h + 1) * d_k]
        v = qkv_ref[:, 2 * d_model + h * d_k: 2 * d_model + (h + 1) * d_k]

        # QK^T contracting d_k directly (no explicit transpose / XLU work).
        scores = lax.dot_general(
            q, k,
            dimension_numbers=(((1,), (1,)), ((), ())),
            preferred_element_type=jnp.float32)

        # numerically-stable softmax along the key axis (kept in VMEM only)
        m = jnp.max(scores, axis=-1, keepdims=True)
        e = jnp.exp(scores - m)
        p = e * _fast_recip(jnp.sum(e, axis=-1, keepdims=True))

        attn_h = jnp.dot(p.astype(v.dtype), v, preferred_element_type=jnp.float32)
        # Fold the output projection in per-head: concat is never materialized.
        acc = acc + jnp.dot(attn_h.astype(wo_ref.dtype),
                            wo_ref[h * d_k:(h + 1) * d_k, :],
                            preferred_element_type=jnp.float32)

    out = acc + bo_ref[...].astype(jnp.float32) + res_ref[...].astype(jnp.float32)
    o_ref[...] = out.astype(o_ref.dtype)


def attn_out(qkv, wo, bo, residual, *, batch, seq, n_heads, d_k, out_dtype=None):
    """qkv: [B*S, 3D], wo: [D, D], bo: [D], residual: [B*S, D] -> [B*S, D]."""
    d_model = n_heads * d_k
    out_dtype = out_dtype or residual.dtype
    kernel = functools.partial(_attn_out_kernel,
                               n_heads=n_heads, d_k=d_k, d_model=d_model)
    return pl.pallas_call(
        kernel,
        out_shape=jax.ShapeDtypeStruct((batch * seq, d_model), out_dtype),
        grid=(batch,),
        in_specs=[
            pl.BlockSpec((seq, 3 * d_model), lambda b: (b, 0)),
            pl.BlockSpec((d_model, d_model), lambda b: (0, 0)),
            pl.BlockSpec((1, d_model), lambda b: (0, 0)),
            pl.BlockSpec((seq, d_model), lambda b: (b, 0)),
        ],
        out_specs=pl.BlockSpec((seq, d_model), lambda b: (b, 0)),
        compiler_params=pltpu.CompilerParams(
            dimension_semantics=("parallel",),
            vmem_limit_bytes=_VMEM_LIMIT_BYTES,
        ),
    )(qkv, wo, bo.reshape(1, d_model), residual)


# ---------------------------------------------------------------------------
# Kernel 3: standalone LayerNorm (final Encoder norm), same math as Kernel 1's LN.
# ---------------------------------------------------------------------------
def _layernorm_kernel(x_ref, a_ref, b_ref, o_ref, *, eps):
    x = x_ref[...].astype(jnp.float32)
    d = x.shape[-1]
    mean = jnp.mean(x, axis=-1, keepdims=True)
    xc = x - mean
    var = jnp.sum(xc * xc, axis=-1, keepdims=True) * (1.0 / (d - 1))
    denom = jnp.sqrt(var) + eps
    y = a_ref[...].astype(jnp.float32) * (xc * _fast_recip(denom)) \
        + b_ref[...].astype(jnp.float32)
    o_ref[...] = y.astype(o_ref.dtype)


def layernorm(x, a, b, *, eps=1e-6, tm=256):
    m, d = x.shape
    tm = _pick_tile(m, tm, 8)
    kernel = functools.partial(_layernorm_kernel, eps=eps)
    return pl.pallas_call(
        kernel,
        out_shape=jax.ShapeDtypeStruct((m, d), x.dtype),
        grid=(m // tm,),
        in_specs=[
            pl.BlockSpec((tm, d), lambda i: (i, 0)),
            pl.BlockSpec((1, d), lambda i: (0, 0)),
            pl.BlockSpec((1, d), lambda i: (0, 0)),
        ],
        out_specs=pl.BlockSpec((tm, d), lambda i: (i, 0)),
        compiler_params=pltpu.CompilerParams(
            dimension_semantics=("parallel",),
            vmem_limit_bytes=_VMEM_LIMIT_BYTES,
        ),
    )(x, a.reshape(1, d), b.reshape(1, d))


# ---------------------------------------------------------------------------
# Encoder forward: N x (pre-norm self-attention sublayer + residual), final norm.
# Per layer: two pallas_calls (LN+QKV fused, MHA+out-proj+residual fused).
# ---------------------------------------------------------------------------
def encoder_forward(params, x, mask=None, *, n_heads):
    # TODO(synk): mask is ignored (mask=None path); dropout is identity (eval mode).
    b, s, d_model = x.shape
    d_k = d_model // n_heads
    h = x.reshape(b * s, d_model)                     # lane-dense [B*S, D] slab

    for layer in params["layers"]:
        qkv = ln_linear(h, layer["ln_a"], layer["ln_b"],
                        layer["wqkv"], layer["bqkv"])             # fused LN + Q/K/V
        h = attn_out(qkv, layer["wo"], layer["bo"], h,
                     batch=b, seq=s, n_heads=n_heads, d_k=d_k)    # fused MHA+proj+res

    out = layernorm(h, params["norm_a"], params["norm_b"])
    return out.reshape(b, s, d_model)


# ---------------------------------------------------------------------------
# Pure-JAX reference for correctness checking
# ---------------------------------------------------------------------------
def reference_encoder(params, x, n_heads, eps=1e-6):
    b, s, d = x.shape
    d_k = d // n_heads

    def ln(t, a, bb):
        mean = t.mean(-1, keepdims=True)
        std = jnp.sqrt(((t - mean) ** 2).sum(-1, keepdims=True) / (t.shape[-1] - 1))
        return a * (t - mean) / (std + eps) + bb

    def mha(t, layer):
        qkv = t @ layer["wqkv"] + layer["bqkv"]
        q, k, v = jnp.split(qkv, 3, axis=-1)

        def split(u):
            return u.reshape(b, s, n_heads, d_k).transpose(0, 2, 1, 3)

        q, k, v = split(q), split(k), split(v)
        scores = jnp.einsum("bhqd,bhkd->bhqk", q, k) / math.sqrt(d_k)
        p = jax.nn.softmax(scores, axis=-1)
        o = jnp.einsum("bhqk,bhkd->bhqd", p, v)
        o = o.transpose(0, 2, 1, 3).reshape(b, s, d)
        return o @ layer["wo"] + layer["bo"]

    for layer in params["layers"]:
        x = x + mha(ln(x, layer["ln_a"], layer["ln_b"]), layer)
    return ln(x, params["norm_a"], params["norm_b"])


# ---------------------------------------------------------------------------
if __name__ == "__main__":
    B, S, D_MODEL, H, N_LAYERS = 2, 8, 32, 4, 2
    D_K = D_MODEL // H

    root = jax.random.PRNGKey(0)
    bound = 1.0 / math.sqrt(D_MODEL)

    def init_layer(key):
        ks = jax.random.split(key, 10)
        u = lambda k, shape: jax.random.uniform(k, shape, jnp.float32, -bound, bound)
        wq, wk, wv = (u(ks[0], (D_MODEL, D_MODEL)),
                      u(ks[1], (D_MODEL, D_MODEL)),
                      u(ks[2], (D_MODEL, D_MODEL)))
        bq, bk, bv = u(ks[3], (D_MODEL,)), u(ks[4], (D_MODEL,)), u(ks[5], (D_MODEL,))
        return {
            "ln_a": 1.0 + 0.1 * jax.random.normal(ks[6], (D_MODEL,), jnp.float32),
            "ln_b": 0.1 * jax.random.normal(ks[7], (D_MODEL,), jnp.float32),
            "wqkv": jnp.concatenate([wq, wk, wv], axis=1),     # [D, 3D]
            "bqkv": jnp.concatenate([bq, bk, bv], axis=0),     # [3D]
            "wo": u(ks[8], (D_MODEL, D_MODEL)),
            "bo": u(ks[9], (D_MODEL,)),
        }

    keys = jax.random.split(root, N_LAYERS + 3)
    params = {
        "layers": [init_layer(keys[i]) for i in range(N_LAYERS)],
        "norm_a": 1.0 + 0.1 * jax.random.normal(keys[N_LAYERS], (D_MODEL,), jnp.float32),
        "norm_b": 0.1 * jax.random.normal(keys[N_LAYERS + 1], (D_MODEL,), jnp.float32),
    }
    x = jax.random.normal(keys[N_LAYERS + 2], (B, S, D_MODEL), jnp.float32)

    encoder = jax.jit(functools.partial(encoder_forward, n_heads=H))
    out = jax.block_until_ready(encoder(params, x))

    ref = reference_encoder(params, x, H)
    np.testing.assert_allclose(np.asarray(out), np.asarray(ref), rtol=2e-3, atol=2e-3)

    print("KERNEL_OK")
</pallas_src>

<mosaic_0001>
module attributes {stable_mosaic.version = 11 : i64} {
  func.func @_layernorm_kernel(%arg0: i32, %arg1: memref<16x32xf32, #tpu.memory_space<vmem>>, %arg2: memref<1x32xf32, #tpu.memory_space<vmem>>, %arg3: memref<1x32xf32, #tpu.memory_space<vmem>>, %arg4: memref<16x32xf32, #tpu.memory_space<vmem>>) attributes {dimension_semantics = [#tpu.dimension_semantics<parallel>], iteration_bounds = array<i64: 1>, scalar_prefetch = 0 : i64, scratch_operands = 0 : i64, tpu.core_type = #tpu.core_type<tc>, window_params = [{transform_indices = @transform_0, window_bounds = array<i64: 16, 32>}, {pipeline_mode = #tpu.pipeline_mode<synchronous>, transform_indices = @transform_1, window_bounds = array<i64: 1, 32>}, {pipeline_mode = #tpu.pipeline_mode<synchronous>, transform_indices = @transform_2, window_bounds = array<i64: 1, 32>}, {transform_indices = @transform_3, window_bounds = array<i64: 16, 32>}]} {
    %c0 = arith.constant 0 : index
    %c0_0 = arith.constant 0 : index
    %0 = vector.load %arg1[%c0, %c0_0] : memref<16x32xf32, #tpu.memory_space<vmem>>, vector<16x32xf32>
    %cst = arith.constant dense<0.000000e+00> : vector<16xf32>
    %1 = vector.multi_reduction <add>, %0, %cst [1] : vector<16x32xf32> to vector<16xf32>
    %2 = vector.shape_cast %1 : vector<16xf32> to vector<16x1xf32>
    %cst_1 = arith.constant 3.200000e+01 : f32
    %3 = vector.broadcast %cst_1 : f32 to vector<16x1xf32>
    %4 = arith.divf %2, %3 : vector<16x1xf32>
    %5 = vector.broadcast %4 : vector<16x1xf32> to vector<16x32xf32>
    %6 = arith.subf %0, %5 : vector<16x32xf32>
    %7 = arith.mulf %6, %6 : vector<16x32xf32>
    %cst_2 = arith.constant dense<0.000000e+00> : vector<16xf32>
    %8 = vector.multi_reduction <add>, %7, %cst_2 [1] : vector<16x32xf32> to vector<16xf32>
    %9 = vector.shape_cast %8 : vector<16xf32> to vector<16x1xf32>
    %cst_3 = arith.constant 0.0322580636 : f32
    %10 = vector.broadcast %cst_3 : f32 to vector<16x1xf32>
    %11 = arith.mulf %9, %10 : vector<16x1xf32>
    %12 = math.sqrt %11 : vector<16x1xf32>
    %cst_4 = arith.constant 9.99999997E-7 : f32
    %13 = vector.broadcast %cst_4 : f32 to vector<16x1xf32>
    %14 = arith.addf %12, %13 : vector<16x1xf32>
    %c0_5 = arith.constant 0 : index
    %c0_6 = arith.constant 0 : index
    %15 = vector.load %arg2[%c0_5, %c0_6] : memref<1x32xf32, #tpu.memory_space<vmem>>, vector<1x32xf32>
    %16 = tpu.reciprocal %14 {approx = true} : vector<16x1xf32> -> vector<16x1xf32>
    %17 = arith.mulf %14, %16 : vector<16x1xf32>
    %cst_7 = arith.constant 2.000000e+00 : f32
    %18 = vector.broadcast %cst_7 : f32 to vector<16x1xf32>
    %19 = arith.subf %18, %17 : vector<16x1xf32>
    %20 = arith.mulf %16, %19 : vector<16x1xf32>
    %21 = vector.broadcast %20 : vector<16x1xf32> to vector<16x32xf32>
    %22 = arith.mulf %6, %21 : vector<16x32xf32>
    %23 = vector.broadcast %15 : vector<1x32xf32> to vector<16x32xf32>
    %24 = arith.mulf %23, %22 : vector<16x32xf32>
    %c0_8 = arith.constant 0 : index
    %c0_9 = arith.constant 0 : index
    %25 = vector.load %arg3[%c0_8, %c0_9] : memref<1x32xf32, #tpu.memory_space<vmem>>, vector<1x32xf32>
    %26 = vector.broadcast %25 : vector<1x32xf32> to vector<16x32xf32>
    %27 = arith.addf %24, %26 : vector<16x32xf32>
    %c0_10 = arith.constant 0 : index
    %c0_11 = arith.constant 0 : index
    %28 = vector.load %arg4[%c0_10, %c0_11] : memref<16x32xf32, #tpu.memory_space<vmem>>, vector<16x32xf32>
    tpu.vector_store %arg4[%c0_10, %c0_11], %27 {strides = array<i32>} : memref<16x32xf32, #tpu.memory_space<vmem>>, vector<16x32xf32>,
    return
  }
  func.func @transform_0(%arg0: i32) -> (i32, i32) {
    %c0_i32 = arith.constant 0 : i32
    %c0_i32_0 = arith.constant 0 : i32
    return %arg0, %c0_i32 : i32, i32
  }
  func.func @transform_1(%arg0: i32) -> (i32, i32) {
    %c0_i32 = arith.constant 0 : i32
    %c0_i32_0 = arith.constant 0 : i32
    %c0_i32_1 = arith.constant 0 : i32
    return %c0_i32, %c0_i32_0 : i32, i32
  }
  func.func @transform_2(%arg0: i32) -> (i32, i32) {
    %c0_i32 = arith.constant 0 : i32
    %c0_i32_0 = arith.constant 0 : i32
    %c0_i32_1 = arith.constant 0 : i32
    return %c0_i32, %c0_i32_0 : i32, i32
  }
  func.func @transform_3(%arg0: i32) -> (i32, i32) {
    %c0_i32 = arith.constant 0 : i32
    %c0_i32_0 = arith.constant 0 : i32
    return %arg0, %c0_i32 : i32, i32
  }
}

module attributes {stable_mosaic.version = 11 : i64} {
  func.func @_ln_linear_kernel(%arg0: i32, %arg1: i32, %arg2: memref<16x32xf32, #tpu.memory_space<vmem>>, %arg3: memref<1x32xf32, #tpu.memory_space<vmem>>, %arg4: memref<1x32xf32, #tpu.memory_space<vmem>>, %arg5: memref<32x96xf32, #tpu.memory_space<vmem>>, %arg6: memref<1x96xf32, #tpu.memory_space<vmem>>, %arg7: memref<16x96xf32, #tpu.memory_space<vmem>>) attributes {dimension_semantics = [#tpu.dimension_semantics<parallel>, #tpu.dimension_semantics<parallel>], iteration_bounds = array<i64: 1, 1>, scalar_prefetch = 0 : i64, scratch_operands = 0 : i64, tpu.core_type = #tpu.core_type<tc>, window_params = [{transform_indices = @transform_0, window_bounds = array<i64: 16, 32>}, {pipeline_mode = #tpu.pipeline_mode<synchronous>, transform_indices = @transform_1, window_bounds = array<i64: 1, 32>}, {pipeline_mode = #tpu.pipeline_mode<synchronous>, transform_indices = @transform_2, window_bounds = array<i64: 1, 32>}, {transform_indices = @transform_3, window_bounds = array<i64: 32, 96>}, {transform_indices = @transform_4, window_bounds = array<i64: 1, 96>}, {transform_indices = @transform_5, window_bounds = array<i64: 16, 96>}]} {
    %c0 = arith.constant 0 : index
    %c0_0 = arith.constant 0 : index
    %0 = vector.load %arg2[%c0, %c0_0] : memref<16x32xf32, #tpu.memory_space<vmem>>, vector<16x32xf32>
    %cst = arith.constant dense<0.000000e+00> : vector<16xf32>
    %1 = vector.multi_reduction <add>, %0, %cst [1] : vector<16x32xf32> to vector<16xf32>
    %2 = vector.shape_cast %1 : vector<16xf32> to vector<16x1xf32>
    %cst_1 = arith.constant 3.200000e+01 : f32
    %3 = vector.broadcast %cst_1 : f32 to vector<16x1xf32>
    %4 = arith.divf %2, %3 : vector<16x1xf32>
    %5 = vector.broadcast %4 : vector<16x1xf32> to vector<16x32xf32>
    %6 = arith.subf %0, %5 : vector<16x32xf32>
    %7 = arith.mulf %6, %6 : vector<16x32xf32>
    %cst_2 = arith.constant dense<0.000000e+00> : vector<16xf32>
    %8 = vector.multi_reduction <add>, %7, %cst_2 [1] : vector<16x32xf32> to vector<16xf32>
    %9 = vector.shape_cast %8 : vector<16xf32> to vector<16x1xf32>
    %cst_3 = arith.constant 0.0322580636 : f32
    %10 = vector.broadcast %cst_3 : f32 to vector<16x1xf32>
    %11 = arith.mulf %9, %10 : vector<16x1xf32>
    %12 = math.sqrt %11 : vector<16x1xf32>
    %cst_4 = arith.constant 9.99999997E-7 : f32
    %13 = vector.broadcast %cst_4 : f32 to vector<16x1xf32>
    %14 = arith.addf %12, %13 : vector<16x1xf32>
    %c0_5 = arith.constant 0 : index
    %c0_6 = arith.constant 0 : index
    %15 = vector.load %arg3[%c0_5, %c0_6] : memref<1x32xf32, #tpu.memory_space<vmem>>, vector<1x32xf32>
    %16 = tpu.reciprocal %14 {approx = true} : vector<16x1xf32> -> vector<16x1xf32>
    %17 = arith.mulf %14, %16 : vector<16x1xf32>
    %cst_7 = arith.constant 2.000000e+00 : f32
    %18 = vector.broadcast %cst_7 : f32 to vector<16x1xf32>
    %19 = arith.subf %18, %17 : vector<16x1xf32>
    %20 = arith.mulf %16, %19 : vector<16x1xf32>
    %21 = vector.broadcast %20 : vector<16x1xf32> to vector<16x32xf32>
    %22 = arith.mulf %6, %21 : vector<16x32xf32>
    %23 = vector.broadcast %15 : vector<1x32xf32> to vector<16x32xf32>
    %24 = arith.mulf %23, %22 : vector<16x32xf32>
    %c0_8 = arith.constant 0 : index
    %c0_9 = arith.constant 0 : index
    %25 = vector.load %arg4[%c0_8, %c0_9] : memref<1x32xf32, #tpu.memory_space<vmem>>, vector<1x32xf32>
    %26 = vector.broadcast %25 : vector<1x32xf32> to vector<16x32xf32>
    %27 = arith.addf %24, %26 : vector<16x32xf32>
    %c0_10 = arith.constant 0 : index
    %c0_11 = arith.constant 0 : index
    %28 = vector.load %arg5[%c0_10, %c0_11] : memref<32x96xf32, #tpu.memory_space<vmem>>, vector<32x96xf32>
    %cst_12 = arith.constant dense<0.000000e+00> : vector<16x96xf32>
    %29 = tpu.matmul %27, %28, %cst_12 {dimension_numbers = #tpu.dot_dimension_numbers<[1], [0], [0], [1], [0, 0, 1, 1], [], []>} : vector<16x32xf32>, vector<32x96xf32>, vector<16x96xf32> -> vector<16x96xf32>
    %c0_13 = arith.constant 0 : index
    %c0_14 = arith.constant 0 : index
    %30 = vector.load %arg6[%c0_13, %c0_14] : memref<1x96xf32, #tpu.memory_space<vmem>>, vector<1x96xf32>
    %31 = vector.broadcast %30 : vector<1x96xf32> to vector<16x96xf32>
    %32 = arith.addf %29, %31 : vector<16x96xf32>
    %c0_15 = arith.constant 0 : index
    %c0_16 = arith.constant 0 : index
    %33 = vector.load %arg7[%c0_15, %c0_16] : memref<16x96xf32, #tpu.memory_space<vmem>>, vector<16x96xf32>
    tpu.vector_store %arg7[%c0_15, %c0_16], %32 {strides = array<i32>} : memref<16x96xf32, #tpu.memory_space<vmem>>, vector<16x96xf32>,
    return
  }
  func.func @transform_0(%arg0: i32, %arg1: i32) -> (i32, i32) {
    %c0_i32 = arith.constant 0 : i32
    %c0_i32_0 = arith.constant 0 : i32
    return %arg0, %c0_i32 : i32, i32
  }
  func.func @transform_1(%arg0: i32, %arg1: i32) -> (i32, i32) {
    %c0_i32 = arith.constant 0 : i32
    %c0_i32_0 = arith.constant 0 : i32
    %c0_i32_1 = arith.constant 0 : i32
    return %c0_i32, %c0_i32_0 : i32, i32
  }
  func.func @transform_2(%arg0: i32, %arg1: i32) -> (i32, i32) {
    %c0_i32 = arith.constant 0 : i32
    %c0_i32_0 = arith.constant 0 : i32
    %c0_i32_1 = arith.constant 0 : i32
    return %c0_i32, %c0_i32_0 : i32, i32
  }
  func.func @transform_3(%arg0: i32, %arg1: i32) -> (i32, i32) {
    %c0_i32 = arith.constant 0 : i32
    %c0_i32_0 = arith.constant 0 : i32
    return %c0_i32, %arg1 : i32, i32
  }
  func.func @transform_4(%arg0: i32, %arg1: i32) -> (i32, i32) {
    %c0_i32 = arith.constant 0 : i32
    %c0_i32_0 = arith.constant 0 : i32
    return %c0_i32, %arg1 : i32, i32
  }
  func.func @transform_5(%arg0: i32, %arg1: i32) -> (i32, i32) {
    %c0_i32 = arith.constant 0 : i32
    return %arg0, %arg1 : i32, i32
  }
}

module attributes {stable_mosaic.version = 11 : i64} {
  func.func @_attn_out_kernel(%arg0: i32, %arg1: memref<8x96xf32, #tpu.memory_space<vmem>>, %arg2: memref<32x32xf32, #tpu.memory_space<vmem>>, %arg3: memref<1x32xf32, #tpu.memory_space<vmem>>, %arg4: memref<8x32xf32, #tpu.memory_space<vmem>>, %arg5: memref<8x32xf32, #tpu.memory_space<vmem>>) attributes {dimension_semantics = [#tpu.dimension_semantics<parallel>], iteration_bounds = array<i64: 2>, scalar_prefetch = 0 : i64, scratch_operands = 0 : i64, tpu.core_type = #tpu.core_type<tc>, window_params = [{transform_indices = @transform_0, window_bounds = array<i64: 8, 96>}, {pipeline_mode = #tpu.pipeline_mode<synchronous>, transform_indices = @transform_1, window_bounds = array<i64: 32, 32>}, {pipeline_mode = #tpu.pipeline_mode<synchronous>, transform_indices = @transform_2, window_bounds = array<i64: 1, 32>}, {transform_indices = @transform_3, window_bounds = array<i64: 8, 32>}, {transform_indices = @transform_4, window_bounds = array<i64: 8, 32>}]} {
    %cst = arith.constant 0.000000e+00 : f32
    %0 = vector.broadcast %cst : f32 to vector<8x32xf32>
    %c0 = arith.constant 0 : index
    %c0_0 = arith.constant 0 : index
    %1 = vector.load %arg1[%c0, %c0_0] : memref<8x96xf32, #tpu.memory_space<vmem>>, vector<8x8xf32>
    %cst_1 = arith.constant 0.353553385 : f32
    %2 = vector.broadcast %cst_1 : f32 to vector<8x8xf32>
    %3 = arith.mulf %1, %2 : vector<8x8xf32>
    %c0_2 = arith.constant 0 : index
    %c32 = arith.constant 32 : index
    %4 = vector.load %arg1[%c0_2, %c32] : memref<8x96xf32, #tpu.memory_space<vmem>>, vector<8x8xf32>
    %c0_3 = arith.constant 0 : index
    %c64 = arith.constant 64 : index
    %5 = vector.load %arg1[%c0_3, %c64] : memref<8x96xf32, #tpu.memory_space<vmem>>, vector<8x8xf32>
    %cst_4 = arith.constant dense<0.000000e+00> : vector<8x8xf32>
    %6 = tpu.matmul %3, %4, %cst_4 {dimension_numbers = #tpu.dot_dimension_numbers<[1], [1], [0], [0], [0, 0, 1, 0], [], []>} : vector<8x8xf32>, vector<8x8xf32>, vector<8x8xf32> -> vector<8x8xf32>
    %cst_5 = arith.constant dense<0xFF800000> : vector<8xf32>
    %7 = vector.multi_reduction <maximumf>, %6, %cst_5 [1] : vector<8x8xf32> to vector<8xf32>
    %8 = vector.shape_cast %7 : vector<8xf32> to vector<8x1xf32>
    %9 = vector.broadcast %8 : vector<8x1xf32> to vector<8x8xf32>
    %10 = arith.subf %6, %9 : vector<8x8xf32>
    %11 = math.exp %10 : vector<8x8xf32>
    %cst_6 = arith.constant dense<0.000000e+00> : vector<8xf32>
    %12 = vector.multi_reduction <add>, %11, %cst_6 [1] : vector<8x8xf32> to vector<8xf32>
    %13 = vector.shape_cast %12 : vector<8xf32> to vector<8x1xf32>
    %14 = tpu.reciprocal %13 {approx = true} : vector<8x1xf32> -> vector<8x1xf32>
    %15 = arith.mulf %13, %14 : vector<8x1xf32>
    %cst_7 = arith.constant 2.000000e+00 : f32
    %16 = vector.broadcast %cst_7 : f32 to vector<8x1xf32>
    %17 = arith.subf %16, %15 : vector<8x1xf32>
    %18 = arith.mulf %14, %17 : vector<8x1xf32>
    %19 = vector.broadcast %18 : vector<8x1xf32> to vector<8x8xf32>
    %20 = arith.mulf %11, %19 : vector<8x8xf32>
    %cst_8 = arith.constant dense<0.000000e+00> : vector<8x8xf32>
    %21 = tpu.matmul %20, %5, %cst_8 {dimension_numbers = #tpu.dot_dimension_numbers<[1], [0], [0], [1], [0, 0, 1, 1], [], []>} : vector<8x8xf32>, vector<8x8xf32>, vector<8x8xf32> -> vector<8x8xf32>
    %c0_9 = arith.constant 0 : index
    %c0_10 = arith.constant 0 : index
    %22 = vector.load %arg2[%c0_9, %c0_10] : memref<32x32xf32, #tpu.memory_space<vmem>>, vector<8x32xf32>
    %cst_11 = arith.constant dense<0.000000e+00> : vector<8x32xf32>
    %23 = tpu.matmul %21, %22, %cst_11 {dimension_numbers = #tpu.dot_dimension_numbers<[1], [0], [0], [1], [0, 0, 1, 1], [], []>} : vector<8x8xf32>, vector<8x32xf32>, vector<8x32xf32> -> vector<8x32xf32>
    %24 = arith.addf %0, %23 : vector<8x32xf32>
    %c0_12 = arith.constant 0 : index
    %c8 = arith.constant 8 : index
    %25 = vector.load %arg1[%c0_12, %c8] : memref<8x96xf32, #tpu.memory_space<vmem>>, vector<8x8xf32>
    %cst_13 = arith.constant 0.353553385 : f32
    %26 = vector.broadcast %cst_13 : f32 to vector<8x8xf32>
    %27 = arith.mulf %25, %26 : vector<8x8xf32>
    %c0_14 = arith.constant 0 : index
    %c40 = arith.constant 40 : index
    %28 = vector.load %arg1[%c0_14, %c40] : memref<8x96xf32, #tpu.memory_space<vmem>>, vector<8x8xf32>
    %c0_15 = arith.constant 0 : index
    %c72 = arith.constant 72 : index
    %29 = vector.load %arg1[%c0_15, %c72] : memref<8x96xf32, #tpu.memory_space<vmem>>, vector<8x8xf32>
    %cst_16 = arith.constant dense<0.000000e+00> : vector<8x8xf32>
    %30 = tpu.matmul %27, %28, %cst_16 {dimension_numbers = #tpu.dot_dimension_numbers<[1], [1], [0], [0], [0, 0, 1, 0], [], []>} : vector<8x8xf32>, vector<8x8xf32>, vector<8x8xf32> -> vector<8x8xf32>
    %cst_17 = arith.constant dense<0xFF800000> : vector<8xf32>
    %31 = vector.multi_reduction <maximumf>, %30, %cst_17 [1] : vector<8x8xf32> to vector<8xf32>
    %32 = vector.shape_cast %31 : vector<8xf32> to vector<8x1xf32>
    %33 = vector.broadcast %32 : vector<8x1xf32> to vector<8x8xf32>
    %34 = arith.subf %30, %33 : vector<8x8xf32>
    %35 = math.exp %34 : vector<8x8xf32>
    %cst_18 = arith.constant dense<0.000000e+00> : vector<8xf32>
    %36 = vector.multi_reduction <add>, %35, %cst_18 [1] : vector<8x8xf32> to vector<8xf32>
    %37 = vector.shape_cast %36 : vector<8xf32> to vector<8x1xf32>
    %38 = tpu.reciprocal %37 {approx = true} : vector<8x1xf32> -> vector<8x1xf32>
    %39 = arith.mulf %37, %38 : vector<8x1xf32>
    %cst_19 = arith.constant 2.000000e+00 : f32
    %40 = vector.broadcast %cst_19 : f32 to vector<8x1xf32>
    %41 = arith.subf %40, %39 : vector<8x1xf32>
    %42 = arith.mulf %38, %41 : vector<8x1xf32>
    %43 = vector.broadcast %42 : vector<8x1xf32> to vector<8x8xf32>
    %44 = arith.mulf %35, %43 : vector<8x8xf32>
    %cst_20 = arith.constant dense<0.000000e+00> : vector<8x8xf32>
    %45 = tpu.matmul %44, %29, %cst_20 {dimension_numbers = #tpu.dot_dimension_numbers<[1], [0], [0], [1], [0, 0, 1, 1], [], []>} : vector<8x8xf32>, vector<8x8xf32>, vector<8x8xf32> -> vector<8x8xf32>
    %c8_21 = arith.constant 8 : index
    %c0_22 = arith.constant 0 : index
    %46 = vector.load %arg2[%c8_21, %c0_22] : memref<32x32xf32, #tpu.memory_space<vmem>>, vector<8x32xf32>
    %cst_23 = arith.constant dense<0.000000e+00> : vector<8x32xf32>
    %47 = tpu.matmul %45, %46, %cst_23 {dimension_numbers = #tpu.dot_dimension_numbers<[1], [0], [0], [1], [0, 0, 1, 1], [], []>} : vector<8x8xf32>, vector<8x32xf32>, vector<8x32xf32> -> vector<8x32xf32>
    %48 = arith.addf %24, %47 : vector<8x32xf32>
    %c0_24 = arith.constant 0 : index
    %c16 = arith.constant 16 : index
    %49 = vector.load %arg1[%c0_24, %c16] : memref<8x96xf32, #tpu.memory_space<vmem>>, vector<8x8xf32>
    %cst_25 = arith.constant 0.353553385 : f32
    %50 = vector.broadcast %cst_25 : f32 to vector<8x8xf32>
    %51 = arith.mulf %49, %50 : vector<8x8xf32>
    %c0_26 = arith.constant 0 : index
    %c48 = arith.constant 48 : index
    %52 = vector.load %arg1[%c0_26, %c48] : memref<8x96xf32, #tpu.memory_space<vmem>>, vector<8x8xf32>
    %c0_27 = arith.constant 0 : index
    %c80 = arith.constant 80 : index
    %53 = vector.load %arg1[%c0_27, %c80] : memref<8x96xf32, #tpu.memory_space<vmem>>, vector<8x8xf32>
    %cst_28 = arith.constant dense<0.000000e+00> : vector<8x8xf32>
    %54 = tpu.matmul %51, %52, %cst_28 {dimension_numbers = #tpu.dot_dimension_numbers<[1], [1], [0], [0], [0, 0, 1, 0], [], []>} : vector<8x8xf32>, vector<8x8xf32>, vector<8x8xf32> -> vector<8x8xf32>
    %cst_29 = arith.constant dense<0xFF800000> : vector<8xf32>
    %55 = vector.multi_reduction <maximumf>, %54, %cst_29 [1] : vector<8x8xf32> to vector<8xf32>
    %56 = vector.shape_cast %55 : vector<8xf32> to vector<8x1xf32>
    %57 = vector.broadcast %56 : vector<8x1xf32> to vector<8x8xf32>
    %58 = arith.subf %54, %57 : vector<8x8xf32>
    %59 = math.exp %58 : vector<8x8xf32>
    %cst_30 = arith.constant dense<0.000000e+00> : vector<8xf32>
    %60 = vector.multi_reduction <add>, %59, %cst_30 [1] : vector<8x8xf32> to vector<8xf32>
    %61 = vector.shape_cast %60 : vector<8xf32> to vector<8x1xf32>
    %62 = tpu.reciprocal %61 {approx = true} : vector<8x1xf32> -> vector<8x1xf32>
    %63 = arith.mulf %61, %62 : vector<8x1xf32>
    %cst_31 = arith.constant 2.000000e+00 : f32
    %64 = vector.broadcast %cst_31 : f32 to vector<8x1xf32>
    %65 = arith.subf %64, %63 : vector<8x1xf32>
    %66 = arith.mulf %62, %65 : vector<8x1xf32>
    %67 = vector.broadcast %66 : vector<8x1xf32> to vector<8x8xf32>
    %68 = arith.mulf %59, %67 : vector<8x8xf32>
    %cst_32 = arith.constant dense<0.000000e+00> : vector<8x8xf32>
    %69 = tpu.matmul %68, %53, %cst_32 {dimension_numbers = #tpu.dot_dimension_numbers<[1], [0], [0], [1], [0, 0, 1, 1], [], []>} : vector<8x8xf32>, vector<8x8xf32>, vector<8x8xf32> -> vector<8x8xf32>
    %c16_33 = arith.constant 16 : index
    %c0_34 = arith.constant 0 : index
    %70 = vector.load %arg2[%c16_33, %c0_34] : memref<32x32xf32, #tpu.memory_space<vmem>>, vector<8x32xf32>
    %cst_35 = arith.constant dense<0.000000e+00> : vector<8x32xf32>
    %71 = tpu.matmul %69, %70, %cst_35 {dimension_numbers = #tpu.dot_dimension_numbers<[1], [0], [0], [1], [0, 0, 1, 1], [], []>} : vector<8x8xf32>, vector<8x32xf32>, vector<8x32xf32> -> vector<8x32xf32>
    %72 = arith.addf %48, %71 : vector<8x32xf32>
    %c0_36 = arith.constant 0 : index
    %c24 = arith.constant 24 : index
    %73 = vector.load %arg1[%c0_36, %c24] : memref<8x96xf32, #tpu.memory_space<vmem>>, vector<8x8xf32>
    %cst_37 = arith.constant 0.353553385 : f32
    %74 = vector.broadcast %cst_37 : f32 to vector<8x8xf32>
    %75 = arith.mulf %73, %74 : vector<8x8xf32>
    %c0_38 = arith.constant 0 : index
    %c56 = arith.constant 56 : index
    %76 = vector.load %arg1[%c0_38, %c56] : memref<8x96xf32, #tpu.memory_space<vmem>>, vector<8x8xf32>
    %c0_39 = arith.constant 0 : index
    %c88 = arith.constant 88 : index
    %77 = vector.load %arg1[%c0_39, %c88] : memref<8x96xf32, #tpu.memory_space<vmem>>, vector<8x8xf32>
    %cst_40 = arith.constant dense<0.000000e+00> : vector<8x8xf32>
    %78 = tpu.matmul %75, %76, %cst_40 {dimension_numbers = #tpu.dot_dimension_numbers<[1], [1], [0], [0], [0, 0, 1, 0], [], []>} : vector<8x8xf32>, vector<8x8xf32>, vector<8x8xf32> -> vector<8x8xf32>
    %cst_41 = arith.constant dense<0xFF800000> : vector<8xf32>
    %79 = vector.multi_reduction <maximumf>, %78, %cst_41 [1] : vector<8x8xf32> to vector<8xf32>
    %80 = vector.shape_cast %79 : vector<8xf32> to vector<8x1xf32>
    %81 = vector.broadcast %80 : vector<8x1xf32> to vector<8x8xf32>
    %82 = arith.subf %78, %81 : vector<8x8xf32>
    %83 = math.exp %82 : vector<8x8xf32>
    %cst_42 = arith.constant dense<0.000000e+00> : vector<8xf32>
    %84 = vector.multi_reduction <add>, %83, %cst_42 [1] : vector<8x8xf32> to vector<8xf32>
    %85 = vector.shape_cast %84 : vector<8xf32> to vector<8x1xf32>
    %86 = tpu.reciprocal %85 {approx = true} : vector<8x1xf32> -> vector<8x1xf32>
    %87 = arith.mulf %85, %86 : vector<8x1xf32>
    %cst_43 = arith.constant 2.000000e+00 : f32
    %88 = vector.broadcast %cst_43 : f32 to vector<8x1xf32>
    %89 = arith.subf %88, %87 : vector<8x1xf32>
    %90 = arith.mulf %86, %89 : vector<8x1xf32>
    %91 = vector.broadcast %90 : vector<8x1xf32> to vector<8x8xf32>
    %92 = arith.mulf %83, %91 : vector<8x8xf32>
    %cst_44 = arith.constant dense<0.000000e+00> : vector<8x8xf32>
    %93 = tpu.matmul %92, %77, %cst_44 {dimension_numbers = #tpu.dot_dimension_numbers<[1], [0], [0], [1], [0, 0, 1, 1], [], []>} : vector<8x8xf32>, vector<8x8xf32>, vector<8x8xf32> -> vector<8x8xf32>
    %c24_45 = arith.constant 24 : index
    %c0_46 = arith.constant 0 : index
    %94 = vector.load %arg2[%c24_45, %c0_46] : memref<32x32xf32, #tpu.memory_space<vmem>>, vector<8x32xf32>
    %cst_47 = arith.constant dense<0.000000e+00> : vector<8x32xf32>
    %95 = tpu.matmul %93, %94, %cst_47 {dimension_numbers = #tpu.dot_dimension_numbers<[1], [0], [0], [1], [0, 0, 1, 1], [], []>} : vector<8x8xf32>, vector<8x32xf32>, vector<8x32xf32> -> vector<8x32xf32>
    %96 = arith.addf %72, %95 : vector<8x32xf32>
    %c0_48 = arith.constant 0 : index
    %c0_49 = arith.constant 0 : index
    %97 = vector.load %arg3[%c0_48, %c0_49] : memref<1x32xf32, #tpu.memory_space<vmem>>, vector<1x32xf32>
    %98 = vector.broadcast %97 : vector<1x32xf32> to vector<8x32xf32>
    %99 = arith.addf %96, %98 : vector<8x32xf32>
    %c0_50 = arith.constant 0 : index
    %c0_51 = arith.constant 0 : index
    %100 = vector.load %arg4[%c0_50, %c0_51] : memref<8x32xf32, #tpu.memory_space<vmem>>, vector<8x32xf32>
    %101 = arith.addf %99, %100 : vector<8x32xf32>
    %c0_52 = arith.constant 0 : index
    %c0_53 = arith.constant 0 : index
    %102 = vector.load %arg5[%c0_52, %c0_53] : memref<8x32xf32, #tpu.memory_space<vmem>>, vector<8x32xf32>
    tpu.vector_store %arg5[%c0_52, %c0_53], %101 {strides = array<i32>} : memref<8x32xf32, #tpu.memory_space<vmem>>, vector<8x32xf32>,
    return
  }
  func.func @transform_0(%arg0: i32) -> (i32, i32) {
    %c0_i32 = arith.constant 0 : i32
    %c0_i32_0 = arith.constant 0 : i32
    return %arg0, %c0_i32 : i32, i32
  }
  func.func @transform_1(%arg0: i32) -> (i32, i32) {
    %c0_i32 = arith.constant 0 : i32
    %c0_i32_0 = arith.constant 0 : i32
    %c0_i32_1 = arith.constant 0 : i32
    return %c0_i32, %c0_i32_0 : i32, i32
  }
  func.func @transform_2(%arg0: i32) -> (i32, i32) {
    %c0_i32 = arith.constant 0 : i32
    %c0_i32_0 = arith.constant 0 : i32
    %c0_i32_1 = arith.constant 0 : i32
    return %c0_i32, %c0_i32_0 : i32, i32
  }
  func.func @transform_3(%arg0: i32) -> (i32, i32) {
    %c0_i32 = arith.constant 0 : i32
    %c0_i32_0 = arith.constant 0 : i32
    return %arg0, %c0_i32 : i32, i32
  }
  func.func @transform_4(%arg0: i32) -> (i32, i32) {
    %c0_i32 = arith.constant 0 : i32
    %c0_i32_0 = arith.constant 0 : i32
    return %arg0, %c0_i32 : i32, i32
  }
}

</mosaic_0001>

<bundles_post_ra>
// kernel: encoder_forward.5
= control target key start
LH: loop header
LB: loop body
LE: loop exit
PB: predicated region body
PF: predicated region fallthrough
CT: control target
= control target key end

     0   :  { %10 = vsyncpa [#allocation3], 0  ;;  %s208_s21 = smov [#allocation2]   ;;  %s209_s23 = smov 128   ;;  %s277_s0 = inlined_call_operand.vmem [shape: f32[16,32], index: 0, kind: input, shape index: {}]   ;;  %s278_s1 = inlined_call_operand.vmem [shape: f32[1,32], index: 1, kind: input, shape index: {}]   ;;  %s279_s2 = inlined_call_operand.vmem [shape: f32[1,32], index: 2, kind: input, shape index: {}]   ;;  %s280_s3 = inlined_call_operand.hbm [shape: f32[32,96], index: 3, kind: input, shape index: {}]   ;;  %s281_s4 = inlined_call_operand.vmem [shape: f32[1,96], index: 4, kind: input, shape index: {}]   ;;  %s282_s5 = inlined_call_operand.vmem [shape: f32[16,96], index: 5, kind: output, shape index: {}]  }
   0x1   :  { %s21_s20 = sshll.u32 %s280_s3, 4  ;;  %s23_s22 = sshll.u32 %s208_s21, 4  ;;  %s22_s20 = int_to_ptr.hbm [resolvable:$true] %s21_s20  ;;  %s24_s22 = int_to_ptr.vmem [resolvable:$true] %s23_s22 }
   0x2   :  { %s210_s24 = smov 8  }
   0x3   :  { %29 = dma.hbm_to_vmem [thread:$0]  %s22_s20, 512, %s24_s22, [#allocation3], %s209_s23, %s209_s23, %s210_s24  }
   0x4   :  { %206 = dma.done.wait [#allocation3], 512  }
   0x5   :  { %207 = vsyncadd [#allocation3], 4294966784  ;;  %vm38_vm0 = vcmask 261120   ;;  %v36_v0 = vld [vmem:[%s277_s0] sm:$0xff]  ;;  %v37_v2 = vld [vmem:[%s277_s0 + $0x8] sm:$0xff]  ;;  %v211_v4 = vmov 32.0  }
   0x6   :  { %v39_v1 = vsel %vm38_vm0, %v36_v0, 0.0  ;;  %v42_v3 = vsel %vm38_vm0, %v37_v2, 0.0  ;;  %172 = vrcp.f32 %v211_v4  ;;  %v117_v21 = vld [vmem:[#allocation2 + $0x18] sm:$0xff]  ;;  %v116_v22 = vld [vmem:[#allocation2 + $0x10] sm:$0xff]  ;;  %v115_v23 = vld [vmem:[#allocation2 + $0x8] sm:$0xff]  ;;  %vm151_vm6 = vcmask 785408  }
   0x7   :  { %40 = vadd.xlane.f32.xlu0 %v39_v1  ;;  %140 = vmatpush.msra.mxu0 %v117_v21  ;;  %v114_v24 = vld [vmem:[#allocation2] sm:$0xff] }
   0x8   :  { %161 = vmatpush.msra.mxu1 %v117_v21  ;;  %v169_v55 = vld [vmem:[%s278_s1] ss:$0 sm:$0xff] }
   0x9   :  { %141 = vmatpush.msra.mxu0 %v116_v22  ;;  %v170_v57 = vld [vmem:[%s279_s2] ss:$0 sm:$0xff] }
   0xa   :  { %162 = vmatpush.msra.mxu1 %v116_v22 }
   0xb   :  { %142 = vmatpush.msra.mxu0 %v115_v23 }
   0xc   :  { %v173_v5 = vpop.eup %172  ;;  %163 = vmatpush.msra.mxu1 %v115_v23 }
   0xd   :  { %v46_v6 = vmul.f32 32.0, %v173_v5  ;;  %vm50_vm1 = vweird.f32 %v173_v5  ;;  %143 = vmatpush.msra.mxu0 %v114_v24 }
   0xe   :  { %164 = vmatpush.msra.mxu1 %v114_v24 }
   0xf   :  { %43 = vadd.xlane.f32.xlu0 %v42_v3  ;;  %v47_v7 = vsub.f32 1.0, %v46_v6  ;;  %v171_v3 = vld [vmem:[%s281_s4] ss:$0 sm:$0xff] }
  0x11   :  { %v48_v8 = vmul.f32 %v173_v5, %v47_v7 }
  0x13   :  { %v49_v9 = vadd.f32 %v173_v5, %v48_v8 }
  0x15   :  { %v51_v10 = vsel %vm50_vm1, %v173_v5, %v49_v9 }
  0x7a   :  { %v41_v11 = vpop.xlane.xlu0 %40 }
  0x7b   :  { %v52_v12 = vmul.f32 %v51_v10, %v41_v11 }
  0x7d   :  { %v54_v13 = vsub.f32 %v36_v0, %v52_v12 }
  0x7f   :  { %v56_v14 = vmul.f32 %v54_v13, %v54_v13 }
  0x81   :  { %v58_v15 = vsel %vm38_vm0, %v56_v14, 0.0 }
  0x82   :  { %59 = vadd.xlane.f32.xlu1 %v58_v15  ;;  %v44_v16 = vpop.xlane.xlu0 %43 }
  0x83   :  { %v53_v17 = vmul.f32 %v51_v10, %v44_v16 }
  0x85   :  { %v254_v18 = vsub.f32 %v37_v2, %v53_v17 }
  0x87   :  { %v57_v19 = vmul.f32 %v254_v18, %v254_v18 }
  0x89   :  { %v61_v20 = vsel %vm38_vm0, %v57_v19, 0.0 }
  0x8a   :  { %62 = vadd.xlane.f32.xlu1 %v61_v20 }
  0xf5   :  { %v60_v25 = vpop.xlane.xlu1 %59 }
  0xf6   :  { %v64_v26 = vmul.f32 0.032258064, %v60_v25 }
  0xf8   :  { %174 = vrsqrt.f32 %v64_v26  ;;  %vm73_vm2 = vcmp.eq.f32.partialorder %v64_v26, inf  ;;  %v76_v39 = vand.u32 2147483648, %v64_v26  ;;  %vm75_vm3 = vcmp.eq.f32.partialorder %v64_v26, 0.0 }
  0xfd   :  { %v63_v27 = vpop.xlane.xlu1 %62 }
  0xfe   :  { %v175_v28 = vpop.eup %174  ;;  %v65_v29 = vmul.f32 0.032258064, %v63_v27 }
  0xff   :  { %v67_v30 = vmul.f32 %v175_v28, %v64_v26 }
 0x100   :  { %176 = vrsqrt.f32 %v65_v29  ;;  %vm85_vm4 = vcmp.eq.f32.partialorder %v65_v29, inf  ;;  %v88_v47 = vand.u32 2147483648, %v65_v29  ;;  %vm87_vm5 = vcmp.eq.f32.partialorder %v65_v29, 0.0 }
 0x101   :  { %v68_v31 = vmul.f32 %v175_v28, %v67_v30 }
 0x103   :  { %v69_v32 = vmul.f32 0.5, %v68_v31 }
 0x105   :  { %v70_v33 = vsub.f32 1.5, %v69_v32 }
 0x106   :  { %v177_v34 = vpop.eup %176 }
 0x107   :  { %v79_v35 = vmul.f32 %v177_v34, %v65_v29  ;;  %v71_v36 = vmul.f32 %v175_v28, %v70_v33 }
 0x109   :  { %v80_v37 = vmul.f32 %v177_v34, %v79_v35  ;;  %v72_v38 = vmul.f32 %v71_v36, %v64_v26 }
 0x10b   :  { %v74_v40 = vsel %vm73_vm2, %v64_v26, %v72_v38  ;;  %v81_v41 = vmul.f32 0.5, %v80_v37 }
 0x10c   :  { %v77_v42 = vsel %vm75_vm3, %v76_v39, %v74_v40 }
 0x10d   :  { %v90_v43 = vadd.f32 1e-06, %v77_v42  ;;  %v82_v44 = vsub.f32 1.5, %v81_v41 }
 0x10f   :  { %178 = vrcp.f32 %v90_v43  ;;  %v83_v45 = vmul.f32 %v177_v34, %v82_v44 }
 0x111   :  { %v84_v46 = vmul.f32 %v83_v45, %v65_v29 }
 0x113   :  { %v86_v48 = vsel %vm85_vm4, %v65_v29, %v84_v46 }
 0x114   :  { %v89_v49 = vsel %vm87_vm5, %v88_v47, %v86_v48 }
 0x115   :  { %v179_v50 = vpop.eup %178  ;;  %v91_v51 = vadd.f32 1e-06, %v89_v49 }
 0x116   :  { %v95_v52 = vmul.f32 %v179_v50, %v90_v43 }
 0x117   :  { %180 = vrcp.f32 %v91_v51 }
 0x118   :  { %v97_v53 = vsub.f32 2.0, %v95_v52 }
 0x11a   :  { %v99_v54 = vmul.f32 %v179_v50, %v97_v53 }
 0x11c   :  { %v101_v56 = vmul.f32 %v99_v54, %v54_v13 }
 0x11d   :  { %v181_v58 = vpop.eup %180 }
 0x11e   :  { %v106_v59 = vmul.f32 %v169_v55, %v101_v56  ;;  %v96_v60 = vmul.f32 %v181_v58, %v91_v51 }
 0x120   :  { %v112_v61 = vadd.f32 %v170_v57, %v106_v59  ;;  %v98_v62 = vsub.f32 2.0, %v96_v60 }
 0x122   :  { %159 = vmatmul.msk.f32.vlgmr.msra.gmra.mxu0 %vm38_vm0, %v112_v61  ;;  %v100_v63 = vmul.f32 %v181_v58, %v98_v62 }
 0x124   :  { %v102_v0 = vmul.f32 %v100_v63, %v254_v18 }
 0x126   :  { %v107_v1 = vmul.f32 %v169_v55, %v102_v0 }
 0x128   :  { %v113_v2 = vadd.f32 %v170_v57, %v107_v1 }
 0x12a   :  { %160 = vmatmul.msk.f32.vlgmr.msra.gmra.mxu1 %vm38_vm0, %v113_v2 }
 0x19f   :  { %v145_v4 = vpop.f32.mrf.mxu0 }
 0x1a0   :  { %v146_v5 = vadd.f32 %v171_v3, %v145_v4 }
 0x1a2   :  { %152 = vst.msk [vmem:[%s282_s5] sm:$0xff] %vm151_vm6, %v146_v5 }
 0x1a7   :  { %v148_v6 = vpop.f32.mrf.mxu1 }
 0x1a8   :  { %v149_v7 = vadd.f32 %v171_v3, %v148_v6 }
 0x1aa   :  { %153 = vst.msk [vmem:[%s282_s5 + $0x8] sm:$0xff] %vm151_vm6, %v149_v7 }
 0x1ab   :  { %158 = vsyncpa [#allocation3], 1 }

// kernel: encoder_forward.9
= control target key start
LH: loop header
LB: loop body
LE: loop exit
PB: predicated region body
PF: predicated region fallthrough
CT: control target
= control target key end

     0   :  { %vm17_vm0 = vcmask 261120   ;;  %s200_s0 = inlined_call_operand.vmem [shape: f32[16,32], index: 0, kind: input, shape index: {}]   ;;  %s201_s1 = inlined_call_operand.vmem [shape: f32[1,32], index: 1, kind: input, shape index: {}]   ;;  %s202_s2 = inlined_call_operand.vmem [shape: f32[1,32], index: 2, kind: input, shape index: {}]   ;;  %s203_s3 = inlined_call_operand.hbm [shape: f32[16,32], index: 3, kind: output, shape index: {}]  }
   0x1   :  { %v15_v0 = vld [vmem:[%s200_s0] sm:$0xff] }
   0x2   :  { %8 = vsyncpa [#allocation3], 0  ;;  %v18_v1 = vsel %vm17_vm0, %v15_v0, 0.0  ;;  %v16_v2 = vld [vmem:[%s200_s0 + $0x8] sm:$0xff]  ;;  %v155_v4 = vmov 32.0   ;;  %s156_s19 = smov [#allocation2]  }
   0x3   :  { %19 = vadd.xlane.f32.xlu0 %v18_v1  ;;  %v21_v3 = vsel %vm17_vm0, %v16_v2, 0.0  ;;  %119 = vrcp.f32 %v155_v4  ;;  %v117_v51 = vld [vmem:[%s201_s1] ss:$0 sm:$0xff]  ;;  %s99_s20 = sshll.u32 %s156_s19, 4  ;;  %s101_s1 = sshll.u32 %s203_s3, 4  ;;  %s100_s20 = int_to_ptr.vmem [resolvable:$true] %s99_s20  ;;  %s102_s1 = int_to_ptr.hbm [resolvable:$true] %s101_s1 }
   0x4   :  { %v118_v53 = vld [vmem:[%s202_s2] ss:$0 sm:$0xff]  ;;  %s157_s2 = smov 128   ;;  %s158_s23 = smov 8  }
   0x9   :  { %v120_v5 = vpop.eup %119 }
   0xa   :  { %v25_v6 = vmul.f32 32.0, %v120_v5  ;;  %vm29_vm1 = vweird.f32 %v120_v5 }
   0xb   :  { %22 = vadd.xlane.f32.xlu0 %v21_v3 }
   0xc   :  { %v26_v7 = vsub.f32 1.0, %v25_v6 }
   0xe   :  { %v27_v8 = vmul.f32 %v120_v5, %v26_v7 }
  0x10   :  { %v28_v9 = vadd.f32 %v120_v5, %v27_v8 }
  0x12   :  { %v30_v10 = vsel %vm29_vm1, %v120_v5, %v28_v9 }
  0x76   :  { %v20_v11 = vpop.xlane.xlu0 %19 }
  0x77   :  { %v31_v12 = vmul.f32 %v30_v10, %v20_v11 }
  0x79   :  { %v33_v13 = vsub.f32 %v15_v0, %v31_v12 }
  0x7b   :  { %v35_v14 = vmul.f32 %v33_v13, %v33_v13 }
  0x7d   :  { %v37_v15 = vsel %vm17_vm0, %v35_v14, 0.0 }
  0x7e   :  { %38 = vadd.xlane.f32.xlu1 %v37_v15  ;;  %v23_v16 = vpop.xlane.xlu0 %22 }
  0x7f   :  { %v32_v17 = vmul.f32 %v30_v10, %v23_v16 }
  0x81   :  { %v34_v18 = vsub.f32 %v16_v2, %v32_v17 }
  0x83   :  { %v36_v19 = vmul.f32 %v34_v18, %v34_v18 }
  0x85   :  { %v40_v20 = vsel %vm17_vm0, %v36_v19, 0.0 }
  0x86   :  { %41 = vadd.xlane.f32.xlu1 %v40_v20 }
  0xf1   :  { %v39_v21 = vpop.xlane.xlu1 %38 }
  0xf2   :  { %v43_v22 = vmul.f32 0.032258064, %v39_v21 }
  0xf4   :  { %121 = vrsqrt.f32 %v43_v22  ;;  %vm52_vm2 = vcmp.eq.f32.partialorder %v43_v22, inf  ;;  %v55_v35 = vand.u32 2147483648, %v43_v22  ;;  %vm54_vm3 = vcmp.eq.f32.partialorder %v43_v22, 0.0 }
  0xf9   :  { %v42_v23 = vpop.xlane.xlu1 %41 }
  0xfa   :  { %v122_v24 = vpop.eup %121  ;;  %v44_v25 = vmul.f32 0.032258064, %v42_v23 }
  0xfb   :  { %v46_v26 = vmul.f32 %v122_v24, %v43_v22 }
  0xfc   :  { %123 = vrsqrt.f32 %v44_v25  ;;  %vm64_vm4 = vcmp.eq.f32.partialorder %v44_v25, inf  ;;  %v67_v43 = vand.u32 2147483648, %v44_v25  ;;  %vm66_vm5 = vcmp.eq.f32.partialorder %v44_v25, 0.0 }
  0xfd   :  { %v47_v27 = vmul.f32 %v122_v24, %v46_v26 }
  0xff   :  { %v48_v28 = vmul.f32 0.5, %v47_v27 }
 0x101   :  { %v49_v29 = vsub.f32 1.5, %v48_v28 }
 0x102   :  { %v124_v30 = vpop.eup %123 }
 0x103   :  { %v50_v31 = vmul.f32 %v122_v24, %v49_v29  ;;  %v58_v32 = vmul.f32 %v124_v30, %v44_v25 }
 0x105   :  { %v51_v33 = vmul.f32 %v50_v31, %v43_v22  ;;  %v59_v34 = vmul.f32 %v124_v30, %v58_v32 }
 0x107   :  { %v53_v36 = vsel %vm52_vm2, %v43_v22, %v51_v33  ;;  %v60_v37 = vmul.f32 0.5, %v59_v34 }
 0x108   :  { %v56_v38 = vsel %vm54_vm3, %v55_v35, %v53_v36 }
 0x109   :  { %v61_v39 = vsub.f32 1.5, %v60_v37  ;;  %v69_v40 = vadd.f32 1e-06, %v56_v38 }
 0x10b   :  { %v62_v41 = vmul.f32 %v124_v30, %v61_v39  ;;  %125 = vrcp.f32 %v69_v40 }
 0x10d   :  { %v63_v42 = vmul.f32 %v62_v41, %v44_v25 }
 0x10f   :  { %v65_v44 = vsel %vm64_vm4, %v44_v25, %v63_v42 }
 0x110   :  { %v68_v45 = vsel %vm66_vm5, %v67_v43, %v65_v44 }
 0x111   :  { %v126_v46 = vpop.eup %125  ;;  %v70_v47 = vadd.f32 1e-06, %v68_v45 }
 0x112   :  { %v74_v48 = vmul.f32 %v126_v46, %v69_v40 }
 0x113   :  { %127 = vrcp.f32 %v70_v47 }
 0x114   :  { %v76_v49 = vsub.f32 2.0, %v74_v48 }
 0x116   :  { %v78_v50 = vmul.f32 %v126_v46, %v76_v49 }
 0x118   :  { %v80_v52 = vmul.f32 %v78_v50, %v33_v13 }
 0x119   :  { %v128_v54 = vpop.eup %127 }
 0x11a   :  { %v75_v55 = vmul.f32 %v128_v54, %v70_v47  ;;  %v85_v56 = vmul.f32 %v117_v51, %v80_v52 }
 0x11c   :  { %v77_v57 = vsub.f32 2.0, %v75_v55  ;;  %v91_v58 = vadd.f32 %v118_v53, %v85_v56 }
 0x11e   :  { %v79_v59 = vmul.f32 %v128_v54, %v77_v57  ;;  %93 = vst.msk [vmem:[#allocation2] sm:$0xff] %vm17_vm0, %v91_v58 }
 0x120   :  { %v81_v60 = vmul.f32 %v79_v59, %v34_v18 }
 0x122   :  { %v86_v61 = vmul.f32 %v117_v51, %v81_v60 }
 0x124   :  { %v92_v62 = vadd.f32 %v118_v53, %v86_v61 }
 0x126   :  { %94 = vst.msk [vmem:[#allocation2 + $0x8] sm:$0xff] %vm17_vm0, %v92_v62 }
 0x127   :  { %107 = dma.vmem_to_hbm [thread:$0]  %s100_s20, 256, %s102_s1, [#allocation3], %s157_s2, %s157_s2, %s158_s23  }
 0x128   :  { %153 = dma.done.wait [#allocation3], 256  }
 0x129   :  { %154 = vsyncadd [#allocation3], 4294967040 }
 0x12a   :  { %112 = vsyncpa [#allocation3], 1 }

// kernel: encoder_forward.6
= control target key start
LH: loop header
LB: loop body
LE: loop exit
PB: predicated region body
PF: predicated region fallthrough
CT: control target
= control target key end

     0   :  { %9 = vsyncpa [#allocation3], 0  ;;  %s844_s15 = smov 0   ;;  %s910_s0 = inlined_call_operand.vmem [shape: f32[16,96], index: 0, kind: input, shape index: {}]   ;;  %s911_s1 = inlined_call_operand.hbm [shape: f32[32,32], index: 1, kind: input, shape index: {}]   ;;  %s912_s2 = inlined_call_operand.vmem [shape: f32[1,32], index: 2, kind: input, shape index: {}]   ;;  %s913_s3 = inlined_call_operand.vmem [shape: f32[16,32], index: 3, kind: input, shape index: {}]   ;;  %s914_s4 = inlined_call_operand.vmem [shape: f32[16,32], index: 4, kind: output, shape index: {}]  }
   0x1 LB: > { %s151_s18 = sshll.u32 %s911_s1, 4  ;;  %s686_s19 = sadd.s32 4294967295, %s803_s15   ;;  %s803_s15 = sphi %s844_s15, %s15_s15   ;;  %s152_s18 = int_to_ptr.hbm [resolvable:$true] %s151_s18 }
   0x2   : > { %p688_p0 = scmp.ge.s32.totalorder %s803_s15, 1  ;;  %p140_p1 = scmp.lt.s32.totalorder %s803_s15, 3 }
   0x3   : > { %p722_p2 = scmp.eq.s32.totalorder %s686_s19, 0  ;;  %s805_s20 = smov [#allocation2]  }
   0x4   : > { %p141_p3 = pnand %p688_p0, %p140_p1  ;;  %s153_s21 = sshll.u32 %s805_s20, 4  ;;  %s154_s21 = int_to_ptr.vmem [resolvable:$true] %s153_s21 }
   0x5   : > { %s806_s22 = smov 128   ;;  %s807_s23 = smov 8  }
   0x6   : > { %p718_p4 = pneg %p141_p3  ;;  %186 = sbr.rel (%p141_p3) target bundleno = 1323 (0x52b), region = 36 }
   0x8   : > { %p719_p5 = pnand %p722_p2, %p718_p4 }
   0xa   : > { %721 = dma.hbm_to_vmem [thread:$0]  (!%p719_p5), %s152_s18, 512, %s154_s21, [#allocation3], %s806_s22, %s806_s22, %s807_s23  }
   0xb   : > { %798 = dma.done.wait (%p722_p2), [#allocation3], 512  }
   0xc   : > { %800 = vsyncadd (%p722_p2), [#allocation3], 4294966784  ;;  %p215_p6 = scmp.lt.s32.totalorder %s686_s19, 1  ;;  %s808_s28 = smov 96   ;;  %vm232_vm0 = vcmask 64512   ;;  %v298_v38 = vld [vmem:[#allocation2] sm:$0xff] }
   0xd   : > { %s809_s29 = smov 120   ;;  %s810_s30 = smov 88   ;;  %v367_v46 = vld [vmem:[#allocation2 + $0x8] sm:$0xff]  ;;  %v482_v63 = vld [vmem:[#allocation2 + $0x10] sm:$0xff]  ;;  %vm607_vm1 = vcmask 261120  }
   0xe   : > { %s916_s19 = smov (!%p215_p6, %s686_s19), 1  ;;  %s811_s5 = smov 56  }
   0xf   : > { %s855_s24 = sshll.u32 %s916_s19, 3  ;;  %s812_s6 = smov 80  }
  0x10   : > { %s218_s27 = scalar_lea.vmem %s910_s0, %s855_s24  ;;  %s813_s7 = smov 72  }
  0x11   : > { %v861_v0 = vld [vmem:[%s218_s27] sm:$0xff]  ;;  %s814_s8 = smov 112   ;;  %s815_s9 = smov 64  }
  0x12   : > { %230 = vrot.lane.b32.xlu0 %v861_v0, %s808_s28  ;;  %v228_v1 = vmul.f32 0.35355338, %v861_v0  ;;  %s816_s10 = smov 104   ;;  %s817_s11 = smov 48  }
  0x13   : > { %s818_s12 = smov 40   ;;  %s222_s16 = scalar_lea.vmem %s913_s3, %s855_s24 }
  0x14   : > { %299 = vrot.lane.b32.xlu1 %v228_v1, %s809_s29  ;;  %s226_s21 = scalar_lea.vmem %s914_s4, %s855_s24 }
  0x1a   : > { %301 = vrot.lane.b32.xlu0 %v861_v0, %s810_s30 }
  0x84   : > { %v231_v2 = vpop.permute.xlu0 %230 }
  0x85   : > { %696 = vmatpush.xpose.msk.msra.mxu0 %vm232_vm0, %v231_v2 }
  0x86   : > { %v300_v4 = vpop.permute.xlu1 %299 }
  0x88   : > { %697 = vmatmul.msk.f32.vlgmr.msra.gmra.mxu0 %vm232_vm0, %v228_v1 }
  0x8c   : > { %v302_v3 = vpop.permute.xlu0 %301 }
  0x8d   : > { %699 = vmatpush.xpose.msk.msra.mxu2 %vm232_vm0, %v302_v3 }
  0x90   : > { %700 = vmatmul.msk.f32.vlgmr.msra.gmra.mxu2 %vm232_vm0, %v300_v4 }
 0x105   : > { %v255_v5 = vpop.f32.mrf.mxu0 }
 0x106   : > { %v258_v6 = vsel %vm232_vm0, %v255_v5, -inf }
 0x107   : > { %259 = vmax.xlane.f32.xlu1 %v258_v6 }
 0x113   : > { %v324_v7 = vpop.f32.mrf.mxu2 }
 0x114   : > { %v327_v8 = vsel %vm232_vm0, %v324_v7, -inf }
 0x115   : > { %328 = vmax.xlane.f32.xlu0 %v327_v8 }
 0x120   : > { %341 = vrot.lane.b32.xlu1 %v861_v0, %s811_s5 }
 0x128   : > { %416 = vrot.lane.b32.xlu1 %v861_v0, %s812_s6 }
 0x129   : > { %509 = vrot.lane.b32.xlu0 %v861_v0, %s813_s7 }
 0x131   : > { %414 = vrot.lane.b32.xlu0 %v228_v1, %s814_s8 }
 0x17a   : > { %v260_v9 = vpop.xlane.xlu1 %259 }
 0x17b   : > { %v261_v10 = vsub.f32 %v255_v5, %v260_v9  ;;  %v575_v9 = vld [vmem:[#allocation2 + $0x18] sm:$0xff] }
 0x17d   : > { %v262_v11 = vmul.f32 1.442695, %v261_v10 }
 0x17f   : > { %747 = vpow2.f32 %v262_v11 }
 0x185   : > { %v748_v12 = vpop.eup %747 }
 0x186   : > { %v264_v13 = vsel %vm232_vm0, %v748_v12, 0.0 }
 0x187   : > { %265 = vadd.xlane.f32.xlu2 %v264_v13 }
 0x188   : > { %v329_v15 = vpop.xlane.xlu0 %328 }
 0x189   : > { %v330_v19 = vsub.f32 %v324_v7, %v329_v15 }
 0x18b   : > { %v331_v20 = vmul.f32 1.442695, %v330_v19 }
 0x18d   : > { %749 = vpow2.f32 %v331_v20 }
 0x192   : > { %v342_v14 = vpop.permute.xlu1 %341 }
 0x193   : > { %362 = vmatpush.msra.mxu3 %v342_v14  ;;  %v750_v21 = vpop.eup %749  ;;  %v746_v14 = vld [vmem:[%s912_s2] ss:$0 sm:$0xff] }
 0x194   : > { %v333_v22 = vsel %vm232_vm0, %v750_v21, 0.0 }
 0x195   : > { %409 = vmatpush.msrb.mxu3 %v298_v38 }
 0x19a   : > { %v417_v16 = vpop.permute.xlu1 %416 }
 0x19b   : > { %v510_v17 = vpop.permute.xlu0 %509  ;;  %704 = vmatpush.xpose.msk.msrb.mxu0 %vm232_vm0, %v417_v16 }
 0x19f   : > { %272 = vrot.lane.b32.xlu2 %v861_v0, %s815_s9 }
 0x1a3   : > { %v415_v18 = vpop.permute.xlu0 %414 }
 0x1a4   : > { %705 = vmatmul.msk.f32.vlgmr.msrb.gmra.mxu0 %vm232_vm0, %v415_v18 }
 0x1c8   : > { %334 = vadd.xlane.f32.xlu2 %v333_v22 }
 0x1e0   : > { %507 = vrot.lane.b32.xlu2 %v228_v1, %s816_s10 }
 0x1fa   : > { %v266_v23 = vpop.xlane.xlu2 %265 }
 0x1fb   : > { %751 = vrcp.f32 %v266_v23 }
 0x201   : > { %v752_v24 = vpop.eup %751 }
 0x202   : > { %v268_v25 = vmul.f32 %v752_v24, %v266_v23  ;;  %v273_v26 = vpop.permute.xlu2 %272 }
 0x203   : > { %293 = vmatpush.msra.mxu1 %v273_v26 }
 0x204   : > { %v269_v27 = vsub.f32 2.0, %v268_v25 }
 0x205   : > { %386 = vmatpush.msrb.mxu1 %v367_v46 }
 0x206   : > { %v270_v28 = vmul.f32 %v752_v24, %v269_v27 }
 0x208   : > { %v271_v29 = vmul.f32 %v748_v12, %v270_v28 }
 0x20a   : > { %698 = vmatmul.msk.f32.vlgmr.msra.gmra.mxu1 %vm232_vm0, %v271_v29 }
 0x20b   : > { %501 = vmatpush.msra.mxu1 %v482_v63 }
 0x221   : > { %v439_v30 = vpop.f32.mrf.mxu0 }
 0x222   : > { %v442_v31 = vsel %vm232_vm0, %v439_v30, -inf }
 0x223   : > { %443 = vmax.xlane.f32.xlu1 %v442_v31 }
 0x23b   : > { %v335_v32 = vpop.xlane.xlu2 %334 }
 0x23c   : > { %753 = vrcp.f32 %v335_v32 }
 0x242   : > { %v754_v33 = vpop.eup %753 }
 0x243   : > { %v337_v34 = vmul.f32 %v754_v33, %v335_v32  ;;  %v508_v40 = vpop.permute.xlu2 %507 }
 0x245   : > { %v338_v35 = vsub.f32 2.0, %v337_v34 }
 0x247   : > { %v339_v36 = vmul.f32 %v754_v33, %v338_v35 }
 0x249   : > { %v340_v37 = vmul.f32 %v750_v21, %v339_v36 }
 0x24b   : > { %701 = vmatmul.msk.f32.vlgmr.msra.gmra.mxu3 %vm232_vm0, %v340_v37 }
 0x24c   : > { %708 = vmatpush.xpose.msk.msra.mxu3 %vm232_vm0, %v510_v17  ;;  %v605_v17 = vld [vmem:[%s222_s16] sm:$0xff] }
 0x287   : > { %v295_v39 = vpop.f32.mrf.mxu1 }
 0x288   : > { %703 = vmatmul.msk.f32.vlgmr.msrb.gmra.mxu3 %vm232_vm0, %v295_v39 }
 0x290   : > { %709 = vmatmul.msk.f32.vlgmr.msra.gmra.mxu3 %vm232_vm0, %v508_v40 }
 0x296   : > { %v444_v41 = vpop.xlane.xlu1 %443 }
 0x297   : > { %v445_v42 = vsub.f32 %v439_v30, %v444_v41 }
 0x299   : > { %v446_v43 = vmul.f32 1.442695, %v445_v42 }
 0x29b   : > { %755 = vpow2.f32 %v446_v43 }
 0x2a1   : > { %v756_v44 = vpop.eup %755 }
 0x2a2   : > { %v448_v45 = vsel %vm232_vm0, %v756_v44, 0.0 }
 0x2a3   : > { %449 = vadd.xlane.f32.xlu2 %v448_v45 }
 0x2ce   : > { %v364_v47 = vpop.f32.mrf.mxu3 }
 0x2cf   : > { %702 = vmatmul.msk.f32.vlgmr.msrb.gmra.mxu1 %vm232_vm0, %v364_v47 }
 0x30b   : > { %v411_v48 = vpop.f32.mrf.mxu3 }
 0x313   : > { %v532_v49 = vpop.f32.mrf.mxu3 }
 0x314   : > { %v535_v50 = vsel %vm232_vm0, %v532_v49, -inf }
 0x315   : > { %536 = vmax.xlane.f32.xlu0 %v535_v50 }
 0x316   : > { %v450_v51 = vpop.xlane.xlu2 %449 }
 0x317   : > { %757 = vrcp.f32 %v450_v51 }
 0x31d   : > { %v758_v55 = vpop.eup %757 }
 0x31e   : > { %v452_v56 = vmul.f32 %v758_v55, %v450_v51 }
 0x320   : > { %v453_v58 = vsub.f32 2.0, %v452_v56 }
 0x322   : > { %v454_v60 = vmul.f32 %v758_v55, %v453_v58 }
 0x324   : > { %v455_v61 = vmul.f32 %v756_v44, %v454_v60 }
 0x329   : > { %456 = vrot.lane.b32.xlu0 %v861_v0, %s817_s11 }
 0x34c   : > { %v388_v10 = vpop.f32.mrf.mxu1 }
 0x34d   : > { %v412_v12 = vadd.f32 %v411_v48, %v388_v10 }
 0x388   : > { %v537_v52 = vpop.xlane.xlu0 %536 }
 0x389   : > { %v538_v53 = vsub.f32 %v532_v49, %v537_v52 }
 0x38b   : > { %v539_v54 = vmul.f32 1.442695, %v538_v53 }
 0x38d   : > { %759 = vpow2.f32 %v539_v54 }
 0x393   : > { %v760_v57 = vpop.eup %759 }
 0x394   : > { %v541_v59 = vsel %vm232_vm0, %v760_v57, 0.0 }
 0x395   : > { %542 = vadd.xlane.f32.xlu1 %v541_v59 }
 0x39b   : > { %v457_v62 = vpop.permute.xlu0 %456 }
 0x39c   : > { %477 = vmatpush.msrb.mxu2 %v457_v62 }
 0x39d   : > { %706 = vmatmul.msk.f32.vlgmr.msrb.gmra.mxu2 %vm232_vm0, %v455_v61 }
 0x39e   : > { %594 = vmatpush.msra.mxu2 %v575_v9 }
 0x3ae   : > { %549 = vrot.lane.b32.xlu1 %v861_v0, %s818_s12 }
 0x408   : > { %v543_v1 = vpop.xlane.xlu1 %542 }
 0x409   : > { %761 = vrcp.f32 %v543_v1 }
 0x40f   : > { %v762_v2 = vpop.eup %761 }
 0x410   : > { %v545_v3 = vmul.f32 %v762_v2, %v543_v1 }
 0x412   : > { %v546_v4 = vsub.f32 2.0, %v545_v3 }
 0x414   : > { %v547_v5 = vmul.f32 %v762_v2, %v546_v4 }
 0x416   : > { %v548_v6 = vmul.f32 %v760_v57, %v547_v5 }
 0x420   : > { %v479_v7 = vpop.f32.mrf.mxu2  ;;  %v550_v8 = vpop.permute.xlu1 %549 }
 0x421   : > { %707 = vmatmul.msk.f32.vlgmr.msra.gmra.mxu1 %vm232_vm0, %v479_v7  ;;  %570 = vmatpush.msra.mxu0 %v550_v8 }
 0x422   : > { %710 = vmatmul.msk.f32.vlgmr.msra.gmra.mxu0 %vm232_vm0, %v548_v6 }
 0x49e   : > { %v503_v11 = vpop.f32.mrf.mxu1 }
 0x49f   : > { %v572_v0 = vpop.f32.mrf.mxu0  ;;  %v506_v13 = vadd.f32 %v503_v11, %v412_v12 }
 0x4a0   : > { %711 = vmatmul.msk.f32.vlgmr.msra.gmra.mxu2 %vm232_vm0, %v572_v0 }
 0x523   : > { %v596_v15 = vpop.f32.mrf.mxu2 }
 0x524   : > { %v599_v16 = vadd.f32 %v596_v15, %v506_v13 }
 0x526   : > { %v604_v18 = vadd.f32 %v746_v14, %v599_v16 }
 0x528   : > { %v606_v19 = vadd.f32 %v605_v17, %v604_v18 }
 0x52a   : > { %608 = vst.msk [vmem:[%s226_s21] sm:$0xff] %vm607_vm1, %v606_v19 }
 0x52b PF: > { %s15_s15 = sadd.s32 1, %s803_s15  }
 0x52c   : > { %p12_p7 = scmp.ge.s32.totalorder %s15_s15, 4  }
 0x52e   :  { %14 = sbr.rel (!%p12_p7) target bundleno = 1 (0x1), region = 74 }
 0x533   :  { %628 = vsyncpa [#allocation3], 1 }
 0x534   :  { %630 = vsyncpa [#allocation3 + $0x1], 1 }

</bundles_post_ra>
